<compile_context>
chip_gen: v7x
topology: tpu7x:2x2x1
jax: 0.10.0
libtpu: 0.0.40
codegen_flags: <defaults>
</compile_context>

<pallas_src>
import functools
import math

import jax
import jax.numpy as jnp
from jax.experimental import pallas as pl
from jax.experimental.pallas import tpu as pltpu


# --------------------------------------------------------------------------
# Kernel 1: 1x1 conv + GroupNorm(32, D), NCHW, grid = (B, 2 passes, HW tiles).
#   pass 0: y = W @ x_tile (+bias), accumulate per-group sum / sumsq in scratch
#   pass 1: recompute y_tile, normalize with per-sample scale/shift, store bf16
# --------------------------------------------------------------------------
def _input_proj_gn_kernel(x_ref, wt_ref, b_ref, gamma_ref, beta_ref,
                          gmat_ref, gmatT_ref,
                          o_ref, stats_ref, scale_ref, shift_ref,
                          *, hw_total, cpg, eps):
    p = pl.program_id(1)   # 0 = stats pass, 1 = normalize pass
    t = pl.program_id(2)   # HW tile

    x = x_ref[...].astype(jnp.bfloat16)                       # [C, tile_hw]
    # 1x1 conv == channel matmul; HW stays on the lane axis (NCHW preserved).
    y = jnp.dot(wt_ref[...], x,
                preferred_element_type=jnp.float32) + b_ref[...]   # [D, tile_hw] f32

    @pl.when(jnp.logical_and(p == 0, t == 0))
    def _():
        stats_ref[...] = jnp.zeros_like(stats_ref)

    @pl.when(p == 0)
    def _():
        ch_sum = jnp.sum(y, axis=1, keepdims=True)             # [D, 1]
        ch_ssq = jnp.sum(y * y, axis=1, keepdims=True)         # [D, 1]
        stacked = jnp.concatenate([ch_sum, ch_ssq], axis=1)    # [D, 2]
        # channel -> group reduce via hoisted one-hot [G, D] (input, not rebuilt)
        stats_ref[...] += jnp.dot(gmat_ref[...], stacked,
                                  preferred_element_type=jnp.float32)  # [G, 2]

    @pl.when(jnp.logical_and(p == 1, t == 0))
    def _():
        n = float(hw_total * cpg)
        g_sum = stats_ref[:, 0:1]                              # [G, 1]
        g_ssq = stats_ref[:, 1:2]
        g_mean = g_sum / n
        # NOTE: E[x^2]-E[x]^2 in f32 with clamp; fine for conv+GN activations.
        g_var = jnp.maximum(g_ssq / n - g_mean * g_mean, 0.0)
        # group -> channel broadcast via hoisted one-hot [D, G]
        mean_c = jnp.dot(gmatT_ref[...], g_mean,
                         preferred_element_type=jnp.float32)   # [D, 1]
        var_c = jnp.dot(gmatT_ref[...], g_var,
                        preferred_element_type=jnp.float32)    # [D, 1]
        sc = jax.lax.rsqrt(var_c + eps) * gamma_ref[...]
        scale_ref[...] = sc
        shift_ref[...] = beta_ref[...] - mean_c * sc

    @pl.when(p == 1)
    def _():
        o_ref[...] = (y * scale_ref[...] + shift_ref[...]).astype(o_ref.dtype)


def input_proj_gn(x_nchw, conv_w, conv_b, gn_gamma, gn_beta,
                  num_groups=32, eps=1e-5):
    """Conv2d(Cin, D, kernel=1) + GroupNorm(num_groups, D). NCHW in, NCHW out (bf16)."""
    B, C, H, W = x_nchw.shape
    D = conv_w.shape[0]
    HW = H * W
    cpg = D // num_groups

    # Largest power-of-two lane tile (>=128) that divides HW; else full HW.
    tile_hw = HW
    for cand in (2048, 1024, 512, 256, 128):
        if HW % cand == 0:
            tile_hw = cand
            break
    n_tiles = HW // tile_hw

    x = x_nchw.reshape(B, C, HW)                               # free reshape, stays f32
    wt = conv_w.reshape(D, C).astype(jnp.bfloat16)             # [D, Cin]
    bias = conv_b.reshape(D, 1).astype(jnp.float32)
    gamma = gn_gamma.reshape(D, 1).astype(jnp.float32)
    beta = gn_beta.reshape(D, 1).astype(jnp.float32)

    # channel->group one-hot matrices, built once in the wrapper (hoisted).
    g_i = jax.lax.broadcasted_iota(jnp.int32, (num_groups, D), 0)
    c_i = jax.lax.broadcasted_iota(jnp.int32, (num_groups, D), 1)
    gmat = ((c_i >= g_i * cpg) & (c_i < (g_i + 1) * cpg)).astype(jnp.float32)  # [G, D]
    gmatT = gmat.T                                                              # [D, G]

    kernel = functools.partial(_input_proj_gn_kernel,
                               hw_total=HW, cpg=cpg, eps=eps)
    out = pl.pallas_call(
        kernel,
        out_shape=jax.ShapeDtypeStruct((B, D, HW), jnp.bfloat16),
        grid_spec=pltpu.PrefetchScalarGridSpec(
            num_scalar_prefetch=0,
            grid=(B, 2, n_tiles),
            in_specs=[
                pl.BlockSpec((None, C, tile_hw), lambda b, p, t: (b, 0, t)),
                pl.BlockSpec((D, C), lambda b, p, t: (0, 0)),
                pl.BlockSpec((D, 1), lambda b, p, t: (0, 0)),
                pl.BlockSpec((D, 1), lambda b, p, t: (0, 0)),
                pl.BlockSpec((D, 1), lambda b, p, t: (0, 0)),
                pl.BlockSpec((num_groups, D), lambda b, p, t: (0, 0)),
                pl.BlockSpec((D, num_groups), lambda b, p, t: (0, 0)),
            ],
            # Pass 0 parks the output window at tile 0 (never written there);
            # pass 1 walks the real tiles, so only correct data reaches HBM.
            out_specs=pl.BlockSpec((None, D, tile_hw),
                                   lambda b, p, t: (b, 0, t * p)),
            scratch_shapes=[
                pltpu.VMEM((num_groups, 2), jnp.float32),   # [sum, sumsq] per group
                pltpu.VMEM((D, 1), jnp.float32),            # per-channel scale
                pltpu.VMEM((D, 1), jnp.float32),            # per-channel shift
            ],
        ),
        compiler_params=pltpu.CompilerParams(
            dimension_semantics=("parallel", "arbitrary", "arbitrary"),
            vmem_limit_bytes=32 * 1024 * 1024),
    )(x, wt, bias, gamma, beta, gmat, gmatT)
    return out.reshape(B, D, H, W)


# --------------------------------------------------------------------------
# Kernel 2: fused prediction heads, grid over M = L*B*Q row tiles.
#   output slab columns: [0..D)       -> scratch lanes (sliced off)
#                        [D..D+C)     -> class logits
#                        [D+C..D+C+4) -> box coords (sigmoid)
# --------------------------------------------------------------------------
def _heads_kernel(hs_ref, ref_ref, wa_ref, ba_ref, w2_ref, b2_ref,
                  w3p_ref, b3p_ref, sel_ref, o_ref, *, d, c, eps):
    h = hs_ref[...].astype(jnp.bfloat16)                           # [tm, D]
    # fused (bbox-MLP layer-1 | class head) matmul, lane-padded to NPAD
    a = jnp.dot(h, wa_ref[...],
                preferred_element_type=jnp.float32) + ba_ref[...]  # [tm, NPAD]
    t1 = jnp.maximum(a[:, :d], 0.0).astype(jnp.bfloat16)           # [tm, D]
    t2 = jnp.maximum(jnp.dot(t1, w2_ref[...],
                             preferred_element_type=jnp.float32) + b2_ref[...],
                     0.0).astype(jnp.bfloat16)                     # [tm, D]
    tmp = jnp.dot(t2, w3p_ref[...],
                  preferred_element_type=jnp.float32) + b3p_ref[...]  # [tm, NPAD]

    # narrow [tm, 2] reference -> inverse_sigmoid -> expand to the box lanes
    # via a tiny one-hot selector matmul (adds 0 everywhere else).
    r = jnp.clip(ref_ref[...], 0.0, 1.0)
    inv_ref = jnp.log(jnp.maximum(r, eps)) - jnp.log(jnp.maximum(1.0 - r, eps))
    z = tmp + jnp.dot(inv_ref, sel_ref[...],
                      preferred_element_type=jnp.float32)          # [tm, NPAD]
    # sigmoid as 0.5*(1+tanh(z/2)): single EUP push, exact (no approx recip).
    coord = 0.5 * (1.0 + jnp.tanh(0.5 * z))

    lane = jax.lax.broadcasted_iota(jnp.int32, a.shape, 1)
    is_logit = (lane >= d) & (lane < d + c)
    o_ref[...] = jnp.where(is_logit, a, coord).astype(o_ref.dtype)


def detr_heads(hs, init_reference, inter_references,
               wc, bc, w1, b1, w2, b2, w3, b3, num_classes,
               eps=1e-5, tile_m=256):
    L, B, Q, D = hs.shape
    C = num_classes
    M = L * B * Q
    NPAD = ((D + C + 4 + 127) // 128) * 128        # 128 for toy, 384 for D=256/C=91
    log_off = D
    box_off = D + C

    tile_m = min(tile_m, M)
    tile_m = max(8, (tile_m // 8) * 8)
    M_pad = ((M + tile_m - 1) // tile_m) * tile_m

    hs_flat = hs.reshape(M, D).astype(jnp.float32)
    # reference per level: lvl 0 -> init_reference, lvl l -> inter_references[l-1]
    ref_stack = jnp.concatenate([init_reference[None], inter_references[:L - 1]],
                                axis=0)                             # [L, B, Q, 2]
    ref_flat = ref_stack.reshape(M, 2).astype(jnp.float32)
    if M_pad > M:
        hs_flat = jnp.concatenate(
            [hs_flat, jnp.zeros((M_pad - M, D), jnp.float32)], axis=0)
        ref_flat = jnp.concatenate(
            [ref_flat, jnp.full((M_pad - M, 2), 0.5, jnp.float32)], axis=0)

    wa = (jnp.zeros((D, NPAD), jnp.float32)
          .at[:, :D].set(w1)
          .at[:, log_off:log_off + C].set(wc)).astype(jnp.bfloat16)
    ba = (jnp.zeros((1, NPAD), jnp.float32)
          .at[:, :D].set(b1)
          .at[:, log_off:log_off + C].set(bc))
    w3p = (jnp.zeros((D, NPAD), jnp.float32)
           .at[:, box_off:box_off + 4].set(w3)).astype(jnp.bfloat16)
    b3p = (jnp.zeros((1, NPAD), jnp.float32)
           .at[:, box_off:box_off + 4].set(b3))
    w2b = w2.astype(jnp.bfloat16)
    b2f = b2.astype(jnp.float32).reshape(1, D)
    sel = (jnp.zeros((2, NPAD), jnp.float32)
           .at[0, box_off].set(1.0)
           .at[1, box_off + 1].set(1.0))

    kernel = functools.partial(_heads_kernel, d=D, c=C, eps=eps)
    grid_m = M_pad // tile_m
    # TODO(synk): slab kept f32; switch to bf16 if downstream tolerates it.
    slab = pl.pallas_call(
        kernel,
        out_shape=jax.ShapeDtypeStruct((M_pad, NPAD), jnp.float32),
        grid_spec=pltpu.PrefetchScalarGridSpec(
            num_scalar_prefetch=0,
            grid=(grid_m,),
            in_specs=[
                pl.BlockSpec((tile_m, D), lambda i: (i, 0)),
                pl.BlockSpec((tile_m, 2), lambda i: (i, 0)),
                pl.BlockSpec((D, NPAD), lambda i: (0, 0)),
                pl.BlockSpec((1, NPAD), lambda i: (0, 0)),
                pl.BlockSpec((D, D), lambda i: (0, 0)),
                pl.BlockSpec((1, D), lambda i: (0, 0)),
                pl.BlockSpec((D, NPAD), lambda i: (0, 0)),
                pl.BlockSpec((1, NPAD), lambda i: (0, 0)),
                pl.BlockSpec((2, NPAD), lambda i: (0, 0)),
            ],
            out_specs=pl.BlockSpec((tile_m, NPAD), lambda i: (i, 0)),
        ),
        compiler_params=pltpu.CompilerParams(
            dimension_semantics=("parallel",),
            vmem_limit_bytes=32 * 1024 * 1024),
    )(hs_flat, ref_flat, wa, ba, w2b, b2f, w3p, b3p, sel)

    logits = slab[:M, log_off:log_off + C].reshape(L, B, Q, C)
    coord = slab[:M, box_off:box_off + 4].reshape(L, B, Q, 4)
    return logits, coord


# --------------------------------------------------------------------------
# Pure-JAX references (mirror the kernels' bf16-input / f32-accum policy)
# --------------------------------------------------------------------------
def _ref_input_proj_gn(x_nchw, w, b, gamma, beta, G, eps=1e-5):
    B, C, H, W = x_nchw.shape
    D = w.shape[0]
    xb = x_nchw.astype(jnp.bfloat16).astype(jnp.float32)
    wb = w.reshape(D, C).astype(jnp.bfloat16).astype(jnp.float32)
    y = jnp.einsum('bchw,dc->bdhw', xb, wb,
                   precision=jax.lax.Precision.HIGHEST) + b[None, :, None, None]
    yg = y.reshape(B, G, D // G, H, W)
    mean = yg.mean(axis=(2, 3, 4), keepdims=True)
    var = yg.var(axis=(2, 3, 4), keepdims=True)
    yn = ((yg - mean) / jnp.sqrt(var + eps)).reshape(B, D, H, W)
    return yn * gamma[None, :, None, None] + beta[None, :, None, None]   # NCHW


def _ref_heads(hs, init_reference, inter_references,
               wc, bc, w1, b1, w2, b2, w3, b3, eps=1e-5):
    L = hs.shape[0]
    hp = jax.lax.Precision.HIGHEST
    bf = lambda t: t.astype(jnp.bfloat16).astype(jnp.float32)
    h = bf(hs)
    logits = jnp.einsum('lbqd,dc->lbqc', h, bf(wc), precision=hp) + bc.reshape(1, 1, 1, -1)
    t = jax.nn.relu(jnp.einsum('lbqd,de->lbqe', h, bf(w1), precision=hp) + b1.reshape(1, 1, 1, -1))
    t = jax.nn.relu(jnp.einsum('lbqd,de->lbqe', bf(t), bf(w2), precision=hp) + b2.reshape(1, 1, 1, -1))
    tmp = jnp.einsum('lbqd,de->lbqe', bf(t), bf(w3), precision=hp) + b3.reshape(1, 1, 1, -1)
    ref_stack = jnp.concatenate([init_reference[None], inter_references[:L - 1]], axis=0)
    r = jnp.clip(ref_stack, 0.0, 1.0)
    inv = jnp.log(jnp.maximum(r, eps) / jnp.maximum(1.0 - r, eps))
    tmp = tmp.at[..., :2].add(inv)
    coord = jax.nn.sigmoid(tmp)
    return logits, coord


# --------------------------------------------------------------------------
# Main
# --------------------------------------------------------------------------
if __name__ == "__main__":
    key = jax.random.PRNGKey(0)

    # -------- model config (small) --------
    B = 2                     # batch
    D = 64                    # hidden_dim (transformer.d_model)
    G = 32                    # GroupNorm groups (fixed by the module)
    NUM_CLASSES = 8
    Q = 16                    # num_queries
    L = 2                     # decoder layers -> num_pred = L (no two-stage)
    LEVELS = [(4, 16, 16), (8, 8, 8)]   # (Cin, H, W) per feature level

    keys = jax.random.split(key, 16)

    # -------- deterministic parameter init (mirrors __init__) --------
    # input_proj: Conv2d(Cin, D, 1) xavier_uniform, bias 0; GroupNorm affine 1/0
    proj_params = []
    for li, (cin, _, _) in enumerate(LEVELS):
        bound = math.sqrt(6.0 / (cin + D))
        w = jax.random.uniform(keys[li], (D, cin, 1, 1), jnp.float32, -bound, bound)
        proj_params.append(dict(w=w,
                                b=jnp.zeros((D,), jnp.float32),
                                gamma=jnp.ones((D,), jnp.float32),
                                beta=jnp.zeros((D,), jnp.float32)))

    # class_embed: Linear(D, num_classes); bias = -log((1-p)/p), p=0.01
    bias_value = -math.log((1 - 0.01) / 0.01)
    kc = 1.0 / math.sqrt(D)
    wc = jax.random.uniform(keys[4], (D, NUM_CLASSES), jnp.float32, -kc, kc)
    bc = jnp.full((1, NUM_CLASSES), bias_value, jnp.float32)

    # bbox_embed: MLP(D, D, 4, 3); last layer weight=0, bias=[0,0,-2,-2]
    w1 = jax.random.uniform(keys[5], (D, D), jnp.float32, -kc, kc)
    b1 = jax.random.uniform(keys[6], (1, D), jnp.float32, -kc, kc)
    w2 = jax.random.uniform(keys[7], (D, D), jnp.float32, -kc, kc)
    b2 = jax.random.uniform(keys[8], (1, D), jnp.float32, -kc, kc)
    w3 = jnp.zeros((D, 4), jnp.float32)
    b3 = jnp.array([[0.0, 0.0, -2.0, -2.0]], jnp.float32)

    # buffers
    cls_means = jnp.zeros((NUM_CLASSES, 256), jnp.float32)
    cls_stds = jnp.zeros((NUM_CLASSES, 256), jnp.float32)
    ext_1 = jnp.zeros((NUM_CLASSES, 256), jnp.float32)
    ext_2 = jnp.zeros((NUM_CLASSES, 256), jnp.float32)

    # -------- synthetic backbone / transformer outputs (external modules) ----
    feats = [jax.random.normal(keys[9 + li], (B, cin, h, w), jnp.float32)
             for li, (cin, h, w) in enumerate(LEVELS)]
    hs = jax.random.normal(keys[11], (L, B, Q, D), jnp.float32)
    init_reference = jax.random.uniform(keys[12], (B, Q, 2), jnp.float32, 0.05, 0.95)
    inter_references = jax.random.uniform(keys[13], (L, B, Q, 2), jnp.float32, 0.05, 0.95)

    # -------- input_proj (tiled Pallas kernel, NCHW in / NCHW bf16 out) ------
    srcs = []
    for li, p in enumerate(proj_params):
        src = input_proj_gn(feats[li], p['w'], p['b'], p['gamma'], p['beta'],
                            num_groups=G)                        # [B, D, H, W] bf16
        srcs.append(src)
        ref = _ref_input_proj_gn(feats[li], p['w'], p['b'], p['gamma'],
                                 p['beta'], G)
        assert jnp.allclose(src.astype(jnp.float32), ref,
                            atol=3e-2, rtol=3e-2), "input_proj mismatch"

    # -------- prediction heads (row-tiled fused Pallas call over all levels) --
    outputs_class, outputs_coord = detr_heads(
        hs, init_reference, inter_references,
        wc, bc, w1, b1, w2, b2, w3, b3, NUM_CLASSES, tile_m=32)
    rl, rc = _ref_heads(hs, init_reference, inter_references,
                        wc, bc, w1, b1, w2, b2, w3, b3)
    assert jnp.allclose(outputs_class, rl, atol=2e-3, rtol=2e-3), "logits mismatch"
    assert jnp.allclose(outputs_coord, rc, atol=5e-3, rtol=5e-3), "coord mismatch"

    # -------- assemble output dict (aux_loss=True, eval mode, no two-stage) --
    out = {
        'pred_logits_both': outputs_class[-1],
        'is_training': False,
        'cls_means': cls_means,
        'cls_stds': cls_stds,
        'ext_1': ext_1,
        'ext_2': ext_2,
        'final_classifier': {'weight': wc.T, 'bias': bc[0]},
        'first_classifier': {'weight': wc.T, 'bias': bc[0]},
        'pred_logits': outputs_class[-1],
        'pred_boxes': outputs_coord[-1],
        'object_embedding': hs[-1],
        'first_embedding': hs[0],
        'aux_outputs': [{'pred_logits': a, 'pred_boxes': b_}
                        for a, b_ in zip(outputs_class[:-1], outputs_coord[:-1])],
    }

    jax.block_until_ready(out['pred_logits'])
    jax.block_until_ready(out['pred_boxes'])
    for s in srcs:
        jax.block_until_ready(s)
    print("KERNEL_OK")
</pallas_src>

<mosaic_0001>
module attributes {stable_mosaic.version = 11 : i64} {
  func.func @_input_proj_gn_kernel(%arg0: i32, %arg1: i32, %arg2: i32, %arg3: memref<1x4x256xf32, #tpu.memory_space<vmem>>, %arg4: memref<64x4xbf16, #tpu.memory_space<vmem>>, %arg5: memref<64x1xf32, #tpu.memory_space<vmem>>, %arg6: memref<64x1xf32, #tpu.memory_space<vmem>>, %arg7: memref<64x1xf32, #tpu.memory_space<vmem>>, %arg8: memref<32x64xf32, #tpu.memory_space<vmem>>, %arg9: memref<64x32xf32, #tpu.memory_space<vmem>>, %arg10: memref<1x64x256xbf16, #tpu.memory_space<vmem>>, %arg11: memref<32x2xf32, #tpu.memory_space<vmem>>, %arg12: memref<64x1xf32, #tpu.memory_space<vmem>>, %arg13: memref<64x1xf32, #tpu.memory_space<vmem>>) attributes {dimension_semantics = [#tpu.dimension_semantics<parallel>, #tpu.dimension_semantics<arbitrary>, #tpu.dimension_semantics<arbitrary>], iteration_bounds = array<i64: 2, 2, 1>, scalar_prefetch = 0 : i64, scratch_operands = 3 : i64, tpu.core_type = #tpu.core_type<tc>, window_params = [{transform_indices = @transform_0, window_bounds = array<i64: 1, 4, 256>}, {pipeline_mode = #tpu.pipeline_mode<synchronous>, transform_indices = @transform_1, window_bounds = array<i64: 64, 4>}, {pipeline_mode = #tpu.pipeline_mode<synchronous>, transform_indices = @transform_2, window_bounds = array<i64: 64, 1>}, {pipeline_mode = #tpu.pipeline_mode<synchronous>, transform_indices = @transform_3, window_bounds = array<i64: 64, 1>}, {pipeline_mode = #tpu.pipeline_mode<synchronous>, transform_indices = @transform_4, window_bounds = array<i64: 64, 1>}, {pipeline_mode = #tpu.pipeline_mode<synchronous>, transform_indices = @transform_5, window_bounds = array<i64: 32, 64>}, {pipeline_mode = #tpu.pipeline_mode<synchronous>, transform_indices = @transform_6, window_bounds = array<i64: 64, 32>}, {transform_indices = @transform_7, window_bounds = array<i64: 1, 64, 256>}]} {
    %c0 = arith.constant 0 : index
    %c0_0 = arith.constant 0 : index
    %c0_1 = arith.constant 0 : index
    %0 = vector.load %arg3[%c0, %c0_0, %c0_1] : memref<1x4x256xf32, #tpu.memory_space<vmem>>, vector<1x4x256xf32>
    %1 = vector.shape_cast %0 : vector<1x4x256xf32> to vector<4x256xf32>
    %2 = arith.truncf %1 : vector<4x256xf32> to vector<4x256xbf16>
    %c0_2 = arith.constant 0 : index
    %c0_3 = arith.constant 0 : index
    %3 = vector.load %arg4[%c0_2, %c0_3] : memref<64x4xbf16, #tpu.memory_space<vmem>>, vector<64x4xbf16>
    %cst = arith.constant dense<0.000000e+00> : vector<64x256xf32>
    %4 = tpu.matmul %3, %2, %cst {dimension_numbers = #tpu.dot_dimension_numbers<[1], [0], [0], [1], [0, 0, 1, 1], [], []>} : vector<64x4xbf16>, vector<4x256xbf16>, vector<64x256xf32> -> vector<64x256xf32>
    %c0_4 = arith.constant 0 : index
    %c0_5 = arith.constant 0 : index
    %5 = vector.load %arg5[%c0_4, %c0_5] : memref<64x1xf32, #tpu.memory_space<vmem>>, vector<64x1xf32>
    %6 = vector.broadcast %5 : vector<64x1xf32> to vector<64x256xf32>
    %7 = arith.addf %4, %6 : vector<64x256xf32>
    %c0_i32 = arith.constant 0 : i32
    %8 = arith.cmpi eq, %arg1, %c0_i32 : i32
    %c0_i32_6 = arith.constant 0 : i32
    %9 = arith.cmpi eq, %arg2, %c0_i32_6 : i32
    %10 = arith.andi %8, %9 : i1
    %11 = arith.extui %10 : i1 to i32
    %c0_i32_7 = arith.constant 0 : i32
    %12 = arith.cmpi ne, %11, %c0_i32_7 : i32
    scf.if %12 {
      %cst_14 = arith.constant 0.000000e+00 : f32
      %24 = vector.broadcast %cst_14 : f32 to vector<32x2xf32>
      %c0_15 = arith.constant 0 : index
      %c0_16 = arith.constant 0 : index
      %25 = vector.load %arg11[%c0_15, %c0_16] : memref<32x2xf32, #tpu.memory_space<vmem>>, vector<32x2xf32>
      tpu.vector_store %arg11[%c0_15, %c0_16], %24 {strides = array<i32>} : memref<32x2xf32, #tpu.memory_space<vmem>>, vector<32x2xf32>,
    } else {
    }
    %c0_i32_8 = arith.constant 0 : i32
    %13 = arith.cmpi eq, %arg1, %c0_i32_8 : i32
    %14 = arith.extui %13 : i1 to i32
    %c0_i32_9 = arith.constant 0 : i32
    %15 = arith.cmpi ne, %14, %c0_i32_9 : i32
    scf.if %15 {
      %cst_14 = arith.constant dense<0.000000e+00> : vector<64xf32>
      %24 = vector.multi_reduction <add>, %7, %cst_14 [1] : vector<64x256xf32> to vector<64xf32>
      %25 = vector.shape_cast %24 : vector<64xf32> to vector<64x1xf32>
      %26 = arith.mulf %7, %7 : vector<64x256xf32>
      %cst_15 = arith.constant dense<0.000000e+00> : vector<64xf32>
      %27 = vector.multi_reduction <add>, %26, %cst_15 [1] : vector<64x256xf32> to vector<64xf32>
      %28 = vector.shape_cast %27 : vector<64xf32> to vector<64x1xf32>
      %29 = tpu.concatenate %25, %28 in 1 : vector<64x1xf32>, vector<64x1xf32> -> vector<64x2xf32>
      %c0_16 = arith.constant 0 : index
      %c0_17 = arith.constant 0 : index
      %30 = vector.load %arg11[%c0_16, %c0_17] : memref<32x2xf32, #tpu.memory_space<vmem>>, vector<32x2xf32>
      %c0_18 = arith.constant 0 : index
      %c0_19 = arith.constant 0 : index
      %31 = vector.load %arg8[%c0_18, %c0_19] : memref<32x64xf32, #tpu.memory_space<vmem>>, vector<32x64xf32>
      %cst_20 = arith.constant dense<0.000000e+00> : vector<32x2xf32>
      %32 = tpu.matmul %31, %29, %cst_20 {dimension_numbers = #tpu.dot_dimension_numbers<[1], [0], [0], [1], [0, 0, 1, 1], [], []>} : vector<32x64xf32>, vector<64x2xf32>, vector<32x2xf32> -> vector<32x2xf32>
      %33 = arith.addf %30, %32 : vector<32x2xf32>
      %c0_21 = arith.constant 0 : index
      %c0_22 = arith.constant 0 : index
      %34 = vector.load %arg11[%c0_21, %c0_22] : memref<32x2xf32, #tpu.memory_space<vmem>>, vector<32x2xf32>
      tpu.vector_store %arg11[%c0_21, %c0_22], %33 {strides = array<i32>} : memref<32x2xf32, #tpu.memory_space<vmem>>, vector<32x2xf32>,
    } else {
    }
    %c1_i32 = arith.constant 1 : i32
    %16 = arith.cmpi eq, %arg1, %c1_i32 : i32
    %c0_i32_10 = arith.constant 0 : i32
    %17 = arith.cmpi eq, %arg2, %c0_i32_10 : i32
    %18 = arith.andi %16, %17 : i1
    %19 = arith.extui %18 : i1 to i32
    %c0_i32_11 = arith.constant 0 : i32
    %20 = arith.cmpi ne, %19, %c0_i32_11 : i32
    scf.if %20 {
      %c0_14 = arith.constant 0 : index
      %c0_15 = arith.constant 0 : index
      %24 = vector.load %arg11[%c0_14, %c0_15] : memref<32x2xf32, #tpu.memory_space<vmem>>, vector<32x1xf32>
      %c0_16 = arith.constant 0 : index
      %c1 = arith.constant 1 : index
      %25 = vector.load %arg11[%c0_16, %c1] : memref<32x2xf32, #tpu.memory_space<vmem>>, vector<32x1xf32>
      %cst_17 = arith.constant 5.120000e+02 : f32
      %26 = vector.broadcast %cst_17 : f32 to vector<32x1xf32>
      %27 = arith.divf %24, %26 : vector<32x1xf32>
      %cst_18 = arith.constant 5.120000e+02 : f32
      %28 = vector.broadcast %cst_18 : f32 to vector<32x1xf32>
      %29 = arith.divf %25, %28 : vector<32x1xf32>
      %30 = arith.mulf %27, %27 : vector<32x1xf32>
      %31 = arith.subf %29, %30 : vector<32x1xf32>
      %cst_19 = arith.constant 0.000000e+00 : f32
      %32 = vector.broadcast %cst_19 : f32 to vector<32x1xf32>
      %33 = arith.maximumf %31, %32 : vector<32x1xf32>
      %c0_20 = arith.constant 0 : index
      %c0_21 = arith.constant 0 : index
      %34 = vector.load %arg9[%c0_20, %c0_21] : memref<64x32xf32, #tpu.memory_space<vmem>>, vector<64x32xf32>
      %cst_22 = arith.constant dense<0.000000e+00> : vector<64x1xf32>
      %35 = tpu.matmul %34, %27, %cst_22 {dimension_numbers = #tpu.dot_dimension_numbers<[1], [0], [0], [1], [0, 0, 1, 1], [], []>} : vector<64x32xf32>, vector<32x1xf32>, vector<64x1xf32> -> vector<64x1xf32>
      %c0_23 = arith.constant 0 : index
      %c0_24 = arith.constant 0 : index
      %36 = vector.load %arg9[%c0_23, %c0_24] : memref<64x32xf32, #tpu.memory_space<vmem>>, vector<64x32xf32>
      %cst_25 = arith.constant dense<0.000000e+00> : vector<64x1xf32>
      %37 = tpu.matmul %36, %33, %cst_25 {dimension_numbers = #tpu.dot_dimension_numbers<[1], [0], [0], [1], [0, 0, 1, 1], [], []>} : vector<64x32xf32>, vector<32x1xf32>, vector<64x1xf32> -> vector<64x1xf32>
      %cst_26 = arith.constant 9.99999974E-6 : f32
      %38 = vector.broadcast %cst_26 : f32 to vector<64x1xf32>
      %39 = arith.addf %37, %38 : vector<64x1xf32>
      %40 = math.rsqrt %39 : vector<64x1xf32>
      %c0_27 = arith.constant 0 : index
      %c0_28 = arith.constant 0 : index
      %41 = vector.load %arg6[%c0_27, %c0_28] : memref<64x1xf32, #tpu.memory_space<vmem>>, vector<64x1xf32>
      %42 = arith.mulf %40, %41 : vector<64x1xf32>
      %c0_29 = arith.constant 0 : index
      %c0_30 = arith.constant 0 : index
      %43 = vector.load %arg12[%c0_29, %c0_30] : memref<64x1xf32, #tpu.memory_space<vmem>>, vector<64x1xf32>
      tpu.vector_store %arg12[%c0_29, %c0_30], %42 {strides = array<i32>} : memref<64x1xf32, #tpu.memory_space<vmem>>, vector<64x1xf32>,
      %c0_31 = arith.constant 0 : index
      %c0_32 = arith.constant 0 : index
      %44 = vector.load %arg7[%c0_31, %c0_32] : memref<64x1xf32, #tpu.memory_space<vmem>>, vector<64x1xf32>
      %45 = arith.mulf %35, %42 : vector<64x1xf32>
      %46 = arith.subf %44, %45 : vector<64x1xf32>
      %c0_33 = arith.constant 0 : index
      %c0_34 = arith.constant 0 : index
      %47 = vector.load %arg13[%c0_33, %c0_34] : memref<64x1xf32, #tpu.memory_space<vmem>>, vector<64x1xf32>
      tpu.vector_store %arg13[%c0_33, %c0_34], %46 {strides = array<i32>} : memref<64x1xf32, #tpu.memory_space<vmem>>, vector<64x1xf32>,
    } else {
    }
    %c1_i32_12 = arith.constant 1 : i32
    %21 = arith.cmpi eq, %arg1, %c1_i32_12 : i32
    %22 = arith.extui %21 : i1 to i32
    %c0_i32_13 = arith.constant 0 : i32
    %23 = arith.cmpi ne, %22, %c0_i32_13 : i32
    scf.if %23 {
      %c0_14 = arith.constant 0 : index
      %c0_15 = arith.constant 0 : index
      %24 = vector.load %arg12[%c0_14, %c0_15] : memref<64x1xf32, #tpu.memory_space<vmem>>, vector<64x1xf32>
      %25 = vector.broadcast %24 : vector<64x1xf32> to vector<64x256xf32>
      %26 = arith.mulf %7, %25 : vector<64x256xf32>
      %c0_16 = arith.constant 0 : index
      %c0_17 = arith.constant 0 : index
      %27 = vector.load %arg13[%c0_16, %c0_17] : memref<64x1xf32, #tpu.memory_space<vmem>>, vector<64x1xf32>
      %28 = vector.broadcast %27 : vector<64x1xf32> to vector<64x256xf32>
      %29 = arith.addf %26, %28 : vector<64x256xf32>
      %30 = arith.truncf %29 : vector<64x256xf32> to vector<64x256xbf16>
      %c0_18 = arith.constant 0 : index
      %c0_19 = arith.constant 0 : index
      %c0_20 = arith.constant 0 : index
      %31 = vector.load %arg10[%c0_18, %c0_19, %c0_20] : memref<1x64x256xbf16, #tpu.memory_space<vmem>>, vector<1x64x256xbf16>
      %32 = vector.shape_cast %31 : vector<1x64x256xbf16> to vector<64x256xbf16>
      %33 = vector.shape_cast %30 : vector<64x256xbf16> to vector<1x64x256xbf16>
      tpu.vector_store %arg10[%c0_18, %c0_19, %c0_20], %33 {strides = array<i32>} : memref<1x64x256xbf16, #tpu.memory_space<vmem>>, vector<1x64x256xbf16>,
    } else {
    }
    return
  }
  func.func @transform_0(%arg0: i32, %arg1: i32, %arg2: i32) -> (i32, i32, i32) {
    %c0_i32 = arith.constant 0 : i32
    %c0_i32_0 = arith.constant 0 : i32
    return %arg0, %c0_i32, %arg2 : i32, i32, i32
  }
  func.func @transform_1(%arg0: i32, %arg1: i32, %arg2: i32) -> (i32, i32) {
    %c0_i32 = arith.constant 0 : i32
    %c0_i32_0 = arith.constant 0 : i32
    %c0_i32_1 = arith.constant 0 : i32
    return %c0_i32, %c0_i32_0 : i32, i32
  }
  func.func @transform_2(%arg0: i32, %arg1: i32, %arg2: i32) -> (i32, i32) {
    %c0_i32 = arith.constant 0 : i32
    %c0_i32_0 = arith.constant 0 : i32
    %c0_i32_1 = arith.constant 0 : i32
    return %c0_i32, %c0_i32_0 : i32, i32
  }
  func.func @transform_3(%arg0: i32, %arg1: i32, %arg2: i32) -> (i32, i32) {
    %c0_i32 = arith.constant 0 : i32
    %c0_i32_0 = arith.constant 0 : i32
    %c0_i32_1 = arith.constant 0 : i32
    return %c0_i32, %c0_i32_0 : i32, i32
  }
  func.func @transform_4(%arg0: i32, %arg1: i32, %arg2: i32) -> (i32, i32) {
    %c0_i32 = arith.constant 0 : i32
    %c0_i32_0 = arith.constant 0 : i32
    %c0_i32_1 = arith.constant 0 : i32
    return %c0_i32, %c0_i32_0 : i32, i32
  }
  func.func @transform_5(%arg0: i32, %arg1: i32, %arg2: i32) -> (i32, i32) {
    %c0_i32 = arith.constant 0 : i32
    %c0_i32_0 = arith.constant 0 : i32
    %c0_i32_1 = arith.constant 0 : i32
    return %c0_i32, %c0_i32_0 : i32, i32
  }
  func.func @transform_6(%arg0: i32, %arg1: i32, %arg2: i32) -> (i32, i32) {
    %c0_i32 = arith.constant 0 : i32
    %c0_i32_0 = arith.constant 0 : i32
    %c0_i32_1 = arith.constant 0 : i32
    return %c0_i32, %c0_i32_0 : i32, i32
  }
  func.func @transform_7(%arg0: i32, %arg1: i32, %arg2: i32) -> (i32, i32, i32) {
    %0 = arith.muli %arg2, %arg1 : i32
    %c0_i32 = arith.constant 0 : i32
    %c0_i32_0 = arith.constant 0 : i32
    return %arg0, %c0_i32, %0 : i32, i32, i32
  }
}

</mosaic_0001>

<bundles_post_ra>
// kernel: tpu_custom_call.1
= control target key start
LH: loop header
LB: loop body
LE: loop exit
PB: predicated region body
PF: predicated region fallthrough
CT: control target
= control target key end

     0   :  { %12 = vsyncpa [#allocation6], 0  ;;  %s2245_s0 = inlined_call_operand.vmem [shape: f32[2,4,256], index: 0, kind: input, shape index: {}]   ;;  %s2246_s1 = inlined_call_operand.vmem [shape: bf16[64,4], index: 1, kind: input, shape index: {}]   ;;  %s2247_s2 = inlined_call_operand.vmem [shape: f32[64,1], index: 2, kind: input, shape index: {}]   ;;  %s2248_s3 = inlined_call_operand.vmem [shape: f32[64,1], index: 3, kind: input, shape index: {}]   ;;  %s2249_s4 = inlined_call_operand.vmem [shape: f32[64,1], index: 4, kind: input, shape index: {}]   ;;  %s2250_s5 = inlined_call_operand.vmem [shape: f32[32,64], index: 5, kind: input, shape index: {}]   ;;  %s2251_s6 = inlined_call_operand.vmem [shape: f32[64,32], index: 6, kind: input, shape index: {}]   ;;  %s2252_s7 = inlined_call_operand.hbm [shape: bf16[2,64,256], index: 7, kind: output, shape index: {}]  }
   0x1   :  { %14 = vsyncpa [#allocation6 + $0x1], 0  ;;  %s1814_s24 = smov 0   ;;  %s1816_s25 = smov 0  }
   0x2   :  { %s1818_s26 = smov 0   ;;  %s1820_s27 = smov 0  }
   0x3   :  { %s1822_s28 = smov 0   ;;  %s1824_s29 = smov 0  }
   0x4   :  { %s1826_s30 = smov 0   ;;  %s1828_s8 = smov 0  }
   0x5 LB: > { %2256 = sst [smem:[#allocation8_spill]] %s1760_s30  ;;  %s1351_s9 = sadd.s32 4294967295, %s1764_s8   ;;  %s1764_s8 = sphi %s1828_s8, %s20_s8   ;;  %s1760_s30 = sphi %s1826_s30, %s2264_s30   ;;  %s1756_s29 = sphi %s1824_s29, %s2269_s29   ;;  %s1752_s28 = sphi %s1822_s28, %s2262_s28   ;;  %s1748_s27 = sphi %s1820_s27, %s2268_s27   ;;  %s1744_s26 = sphi %s1818_s26, %s2267_s26   ;;  %s1740_s25 = sphi %s1816_s25, %s2266_s25   ;;  %s1736_s24 = sphi %s1814_s24, %s2265_s24  }
   0x6   : > { %s1352_s10 = sadd.s32 4294967294, %s1764_s8   ;;  %s35_s11 = sadd.s32 1, %s1756_s29 }
   0x7   : > { %p37_p0 = scmp.ge.s32.totalorder %s35_s11, 2  ;;  %s39_s12 = sadd.s32 1, %s1760_s30 }
   0x8   : > { %p214_p1 = scmp.ne.s32.totalorder %s1744_s26, %s1740_s25  ;;  %p215_p2 = scmp.eq.s32.totalorder %s1351_s9, 3 }
   0x9   : > { %s2271_s11 = smov (%p37_p0, %s35_s11), 0  ;;  %s2273_s12 = smov (!%p37_p0, %s39_s12), %s1760_s30 }
   0xa   : > { %2257 = sst [smem:[#allocation9_spill]] %s2271_s11  ;;  %p1863_p3 = por %p215_p2, %p214_p1 }
   0xb   : > { %p220_p4 = scmp.ne.s32.totalorder %s1740_s25, %s1736_s24  ;;  %p41_p5 = scmp.ge.s32.totalorder %s2273_s12, 2 }
   0xc   : > { %p221_p6 = scmp.eq.s32.totalorder %s1352_s10, 3  ;;  %p1355_p7 = scmp.ge.s32.totalorder %s1764_s8, 1 }
   0xd   : > { %p270_p8 = scmp.lt.s32.totalorder %s1764_s8, 5  ;;  %s2275_s12 = smov (%p41_p5, %s2273_s12), 0 }
   0xe   : > { %2259 = sst [smem:[#allocation10_spill]] %s2275_s12  ;;  %p1873_p9 = por %p221_p6, %p220_p4 }
   0xf   : > { %p271_p10 = pnand %p1355_p7, %p270_p8  ;;  %s199_s15 = ssub.s32 %s1760_s30, %s2275_s12 }
  0x10   : > { %s204_s16 = sadd.s32 1, %s1744_s26  ;;  %p202_p11 = scmp.eq.s32.totalorder %s199_s15, 0  ;;  %v1766_v0 = vmov (!%p271_p10), 0   ;;  %v335_v1 = vld [vmem:[%s2247_s2 + $0x10] sm:$0xff] (!%p271_p10)  ;;  %v333_v2 = vld [vmem:[%s2247_s2] sm:$0xff] (!%p271_p10)  ;;  %v336_v3 = vld [vmem:[%s2247_s2 + $0x18] sm:$0xff] (!%p271_p10) }
  0x11   : > { %274 = sbr.rel (%p271_p10) target bundleno = 1358 (0x54e), region = 48  ;;  %s2253_s18 = sand.u32 (!%p271_p10), 1, %s1740_s25   ;;  %453 = vmatprep.mubr.bf16.mxu0 (!%p271_p10), %v1766_v0  ;;  %473 = vmatprep.mubr.bf16.mxu1 (!%p271_p10), %v1766_v0  ;;  %vm414_vm0 = vcmask (!%p271_p10), 1041408   ;;  %v334_v5 = vld [vmem:[%s2247_s2 + $0x8] sm:$0xff] (!%p271_p10)  ;;  %v337_v11 = vld [vmem:[%s2247_s2 + $0x20] sm:$0xff] (!%p271_p10)  ;;  %v1639_v13 = vld [vmem:[%s2246_s1 + $0x10] sm:$0xff] (!%p271_p10)  }
  0x12   : > { %s1881_s17 = scalar_select %p202_p11, %s1744_s26, %s204_s16  }
  0x13   : > { %p307_p12 = scmp.lt.s32.totalorder (!%p271_p10), %s1752_s28, 1  ;;  %s1887_s19 = sshll.u32 (!%p271_p10), %s2253_s18, 6  ;;  %1636 = vset.pattern.permute.xlu1 (!%p271_p10), %v1766_v0  ;;  %1635 = vset.pattern.permute.xlu0 (!%p271_p10), %v1766_v0  ;;  %v338_v10 = vld [vmem:[%s2247_s2 + $0x28] sm:$0xff] (!%p271_p10)  ;;  %v1638_v12 = vld [vmem:[%s2246_s1] sm:$0xff] (!%p271_p10)   ;;  %vm401_vm1 = vcmask (!%p271_p10), 31744   ;;  %v340_v14 = vld [vmem:[%s2247_s2 + $0x38] sm:$0xff] (!%p271_p10) }
  0x14   : > { %353 = vperm.xlu1 (!%p271_p10), %1636, %v335_v1   ;;  %343 = vperm.xlu0 (!%p271_p10), %1635, %v333_v2   ;;  %v339_v15 = vld [vmem:[%s2247_s2 + $0x30] sm:$0xff] (!%p271_p10)  ;;  %v1640_v16 = vld [vmem:[%s2246_s1 + $0x8] sm:$0xff] (!%p271_p10)   ;;  %v1641_v17 = vld [vmem:[%s2246_s1 + $0x18] sm:$0xff] (!%p271_p10)   ;;  %p494_p13 = scmp.eq.s32.totalorder (!%p271_p10), %s1748_s27, 0  ;;  %s1963_s11 = scalar_lea.vmem (!%p271_p10), [#allocation5], %s1887_s19 }
  0x18   : > { %s308_s20 = scalar_select %p307_p12, %s1752_s28, 1  ;;  %358 = vperm.xlu1 %1636, %v336_v3   ;;  %348 = vperm.xlu0 %1635, %v334_v5  }
  0x19   : > { %vm500_vm2 = vcmask (%p494_p13), 15360   ;;  %v1767_v58 = vmov (%p494_p13), 0.0  }
  0x1a   : > { %s1405_s23 = sshll.u32 %s308_s20, 3  ;;  %501 = vst.msk [vmem:[#allocation2] sm:$0xff] (%p494_p13), %vm500_vm2, %v1767_v58  ;;  %502 = vst.msk [vmem:[#allocation2 + $0x8] sm:$0xff] (%p494_p13), %vm500_vm2, %v1767_v58 }
  0x1b   : > { %s314_s18 = scalar_lea.vmem %s2245_s0, %s1405_s23  ;;  %503 = vst.msk [vmem:[#allocation2 + $0x10] sm:$0xff] (%p494_p13), %vm500_vm2, %v1767_v58  ;;  %504 = vst.msk [vmem:[#allocation2 + $0x18] sm:$0xff] (%p494_p13), %vm500_vm2, %v1767_v58 }
  0x1c   : > { %v319_v4 = vld [vmem:[%s314_s18] sm:$0xff]  ;;  %368 = vperm.xlu1 %1636, %v338_v10   ;;  %363 = vperm.xlu0 %1635, %v337_v11  }
  0x1d   : > { %v321_v6 = vcombine.high %v319_v4, %v319_v4  ;;  %v323_v7 = vpack.c.bf16 %v319_v4, %v319_v4 }
  0x1f   : > { %v324_v8 = vpack.c.bf16 %v321_v6, %v321_v6  ;;  %v416_v9 = vsel %vm414_vm0, %v323_v7, 0 }
  0x20   : > { %378 = vperm.xlu1 %1636, %v340_v14   ;;  %373 = vperm.xlu0 %1635, %v339_v15  }
  0x21   : > { %1363 = vmatprep.subr.msk.bf16.mxu0 %vm414_vm0, %v324_v8  ;;  %1547 = vmatprep.subr.msk.bf16.mxu1 %vm414_vm0, %v324_v8 }
  0x22   : > { %422 = vmatpush1.bf16.msra.mxu0 %v416_v9  ;;  %1548 = vmatpush1.bf16.msra.mxu1 %v416_v9 }
  0x25   : > { %1364 = vmatmul.mubr.msk.bf16.vlgmr.msra.gmra.mrb[0].mxu0 %vm401_vm1, %v1638_v12  ;;  %1366 = vmatmul.mubr.msk.bf16.vlgmr.msra.gmra.mrb[0].mxu1 %vm401_vm1, %v1639_v13 }
  0x26   : > { %463 = vmatprep.mubr.bf16.mxu0 %v1766_v0  ;;  %483 = vmatprep.mubr.bf16.mxu1 %v1766_v0 }
  0x2d   : > { %1365 = vmatmul.mubr.msk.bf16.gmra.mrb[4].mxu0 %vm401_vm1, %v1640_v16  ;;  %1367 = vmatmul.mubr.msk.bf16.gmra.mrb[4].mxu1 %vm401_vm1, %v1641_v17 }
  0x93   : > { %v354_v18 = vpop.permute.xlu1 %353  ;;  %v344_v19 = vpop.permute.xlu0 %343 }
  0x97   : > { %v359_v20 = vpop.permute.xlu1 %358  ;;  %v349_v21 = vpop.permute.xlu0 %348 }
  0x9b   : > { %v369_v22 = vpop.permute.xlu1 %368  ;;  %v364_v23 = vpop.permute.xlu0 %363 }
  0x9f   : > { %v379_v40 = vpop.permute.xlu1 %378  ;;  %v374_v41 = vpop.permute.xlu0 %373 }
  0xf8   : > { %v455_v24 = vpop.f32.mrb[0].mxu0  ;;  %v475_v25 = vpop.f32.mrb[0].mxu1 }
  0xf9   : > { %v1930_v26 = vadd.f32 %v455_v24, %v344_v19  ;;  %v1932_v27 = vadd.f32 %v475_v25, %v364_v23  ;;  %v457_v28 = vpop.f32.mrb[1].mxu0  ;;  %v477_v29 = vpop.f32.mrb[1].mxu1 }
  0xfa   : > { %v1934_v30 = vadd.f32 %v457_v28, %v344_v19  ;;  %v1936_v31 = vadd.f32 %v477_v29, %v364_v23  ;;  %v459_v32 = vpop.f32.mrb[2].mxu0  ;;  %v479_v33 = vpop.f32.mrb[2].mxu1 }
  0xfb   : > { %v1938_v34 = vadd.f32 %v459_v32, %v349_v21  ;;  %v1940_v35 = vadd.f32 %v479_v33, %v369_v22  ;;  %v461_v36 = vpop.f32.mrb[3].mxu0  ;;  %v481_v37 = vpop.f32.mrb[3].mxu1 }
  0xfc   : > { %v1942_v38 = vadd.f32 %v461_v36, %v349_v21  ;;  %v1944_v39 = vadd.f32 %v481_v37, %v369_v22 }
  0xfe   : > { %499 = sbr.rel (!%p494_p13) target bundleno = 261 (0x105), region = 52 }
 0x100   : > { %v465_v42 = vpop.f32.mrb[4].mxu0  ;;  %v485_v43 = vpop.f32.mrb[4].mxu1 }
 0x101   : > { %v1946_v44 = vadd.f32 %v465_v42, %v354_v18  ;;  %v1948_v45 = vadd.f32 %v485_v43, %v374_v41  ;;  %v467_v46 = vpop.f32.mrb[5].mxu0  ;;  %v487_v47 = vpop.f32.mrb[5].mxu1 }
 0x102   : > { %v1950_v48 = vadd.f32 %v467_v46, %v354_v18  ;;  %v1952_v49 = vadd.f32 %v487_v47, %v374_v41  ;;  %v469_v50 = vpop.f32.mrb[6].mxu0  ;;  %v489_v51 = vpop.f32.mrb[6].mxu1 }
 0x103   : > { %v1954_v52 = vadd.f32 %v469_v50, %v359_v20  ;;  %v1956_v53 = vadd.f32 %v489_v51, %v379_v40  ;;  %v471_v54 = vpop.f32.mrb[7].mxu0  ;;  %v491_v55 = vpop.f32.mrb[7].mxu1 }
 0x104   : > { %v1958_v56 = vadd.f32 %v471_v54, %v359_v20  ;;  %v1960_v57 = vadd.f32 %v491_v55, %v379_v40 }
 0x105 PF: > { %p1369_p0 = scmp.ne.s32.totalorder %s1748_s27, 0 }
 0x106   : > { %v508_v59 = vadd.f32 (!%p1369_p0), %v1934_v30, %v1930_v26  ;;  %v532_v60 = vmul.f32 (!%p1369_p0), %v1930_v26, %v1930_v26  ;;  %v533_v61 = vmul.f32 (!%p1369_p0), %v1934_v30, %v1934_v30  ;;  %v534_v62 = vmul.f32 (!%p1369_p0), %v1938_v34, %v1938_v34  ;;  %v585_v29 = vld [vmem:[%s2250_s5] sm:$0xff] (!%p1369_p0)  ;;  %v587_v32 = vld [vmem:[%s2250_s5 + $0x10] sm:$0xff] (!%p1369_p0) }
 0x107   : > { %507 = sbr.rel (%p1369_p0) target bundleno = 659 (0x293), region = 56  ;;  %v535_v63 = vmul.f32 (!%p1369_p0), %v1942_v38, %v1942_v38  ;;  %v511_v1 = vadd.f32 (!%p1369_p0), %v1942_v38, %v1938_v34  ;;  %v514_v3 = vadd.f32 (!%p1369_p0), %v1950_v48, %v1946_v44  ;;  %v536_v4 = vmul.f32 (!%p1369_p0), %v1946_v44, %v1946_v44 }
 0x108   : > { %509 = vadd.xlane.f32.xlu0 (!%p1369_p0), %v508_v59  ;;  %v548_v0 = vadd.f32 (!%p1369_p0), %v533_v61, %v532_v60  ;;  %v537_v5 = vmul.f32 (!%p1369_p0), %v1950_v48, %v1950_v48  ;;  %v517_v6 = vadd.f32 (!%p1369_p0), %v1958_v56, %v1954_v52  ;;  %v538_v7 = vmul.f32 (!%p1369_p0), %v1954_v52, %v1954_v52 }
 0x109   : > { %v551_v2 = vadd.f32 (!%p1369_p0), %v535_v63, %v534_v62  ;;  %v539_v8 = vmul.f32 (!%p1369_p0), %v1958_v56, %v1958_v56  ;;  %v520_v11 = vadd.f32 (!%p1369_p0), %v1936_v31, %v1932_v27  ;;  %v540_v12 = vmul.f32 (!%p1369_p0), %v1932_v27, %v1932_v27 }
 0x10a   : > { %549 = vadd.xlane.f32.xlu1 (!%p1369_p0), %v548_v0  ;;  %v554_v9 = vadd.f32 (!%p1369_p0), %v537_v5, %v536_v4  ;;  %v541_v13 = vmul.f32 (!%p1369_p0), %v1936_v31, %v1936_v31  ;;  %v523_v14 = vadd.f32 (!%p1369_p0), %v1944_v39, %v1940_v35  ;;  %v542_v15 = vmul.f32 (!%p1369_p0), %v1940_v35, %v1940_v35 }
 0x10b   : > { %v557_v10 = vadd.f32 (!%p1369_p0), %v539_v8, %v538_v7  ;;  %v543_v16 = vmul.f32 (!%p1369_p0), %v1944_v39, %v1944_v39  ;;  %v526_v19 = vadd.f32 (!%p1369_p0), %v1952_v49, %v1948_v45  ;;  %v544_v20 = vmul.f32 (!%p1369_p0), %v1948_v45, %v1948_v45 }
 0x10c   : > { %512 = vadd.xlane.f32.xlu0 (!%p1369_p0), %v511_v1  ;;  %v560_v17 = vadd.f32 (!%p1369_p0), %v541_v13, %v540_v12  ;;  %v545_v21 = vmul.f32 (!%p1369_p0), %v1952_v49, %v1952_v49  ;;  %v529_v22 = vadd.f32 (!%p1369_p0), %v1960_v57, %v1956_v53  ;;  %v546_v23 = vmul.f32 (!%p1369_p0), %v1956_v53, %v1956_v53  ;;  %v584_v12 = vld [vmem:[#allocation2 + $0x18] sm:$0xff] (!%p1369_p0)  ;;  %v581_v13 = vld [vmem:[#allocation2] sm:$0xff] (!%p1369_p0) }
 0x10d   : > { %v563_v18 = vadd.f32 (!%p1369_p0), %v543_v16, %v542_v15  ;;  %v547_v24 = vmul.f32 (!%p1369_p0), %v1960_v57, %v1960_v57  ;;  %vm589_vm3 = vcmask (!%p1369_p0), 523264   ;;  %vm572_vm4 = vcmask (!%p1369_p0), 7168  }
 0x10e   : > { %552 = vadd.xlane.f32.xlu1 %v551_v2  ;;  %v566_v25 = vadd.f32 %v545_v21, %v544_v20  ;;  %1469 = vmatprep.mubr.msk.f32.mxu0 %vm589_vm3, %v585_v29  ;;  %vm691_vm5 = vcmask 15360  }
 0x10f   : > { %v569_v28 = vadd.f32 %v547_v24, %v546_v23  ;;  %1472 = vmatprep.mubr.msk.f32.mxu1 %vm589_vm3, %v587_v32 }
 0x110   : > { %515 = vadd.xlane.f32.xlu0 %v514_v3 }
 0x112   : > { %518 = vadd.xlane.f32.xlu1 %v517_v6 }
 0x114   : > { %555 = vadd.xlane.f32.xlu0 %v554_v9  ;;  %v586_v9 = vld [vmem:[%s2250_s5 + $0x8] sm:$0xff] }
 0x116   : > { %558 = vadd.xlane.f32.xlu1 %v557_v10  ;;  %v588_v10 = vld [vmem:[%s2250_s5 + $0x18] sm:$0xff] }
 0x118   : > { %521 = vadd.xlane.f32.xlu0 %v520_v11  ;;  %v582_v11 = vld [vmem:[#allocation2 + $0x8] sm:$0xff] }
 0x11a   : > { %524 = vadd.xlane.f32.xlu1 %v523_v14  ;;  %v583_v14 = vld [vmem:[#allocation2 + $0x10] sm:$0xff] }
 0x11c   : > { %561 = vadd.xlane.f32.xlu0 %v560_v17 }
 0x11e   : > { %564 = vadd.xlane.f32.xlu1 %v563_v18 }
 0x120   : > { %527 = vadd.xlane.f32.xlu0 %v526_v19 }
 0x122   : > { %530 = vadd.xlane.f32.xlu1 %v529_v22 }
 0x124   : > { %567 = vadd.xlane.f32.xlu0 %v566_v25 }
 0x126   : > { %570 = vadd.xlane.f32.xlu1 %v569_v28 }
 0x195   : > { %v510_v33 = vpop.xlane.xlu0 %509 }
 0x197   : > { %v550_v36 = vpop.xlane.xlu1 %549 }
 0x198   : > { %v573_v41 = vsel %vm572_vm4, %v510_v33, %v550_v36 }
 0x199   : > { %v513_v37 = vpop.xlane.xlu0 %512 }
 0x19b   : > { %v553_v40 = vpop.xlane.xlu1 %552 }
 0x19c   : > { %v574_v42 = vsel %vm572_vm4, %v513_v37, %v553_v40 }
 0x19d   : > { %v1515_v43 = vpack.c.bf16 %v574_v42, %v573_v41  ;;  %v516_v46 = vpop.xlane.xlu0 %515 }
 0x19f   : > { %v519_v47 = vpop.xlane.xlu1 %518  ;;  %1516 = vmatprep.subr.bf16.mxu0 %v1515_v43  ;;  %1549 = vmatprep.subr.bf16.mxu1 %v1515_v43 }
 0x1a0   : > { %1518 = vmatpush3.bf16.msra.mxu0 %v1515_v43  ;;  %1553 = vmatpush3.bf16.msra.mxu1 %v1515_v43 }
 0x1a1   : > { %v556_v50 = vpop.xlane.xlu0 %555 }
 0x1a2   : > { %v575_v54 = vsel %vm572_vm4, %v516_v46, %v556_v50 }
 0x1a3   : > { %v559_v51 = vpop.xlane.xlu1 %558 }
 0x1a4   : > { %v576_v55 = vsel %vm572_vm4, %v519_v47, %v559_v51 }
 0x1a5   : > { %v1519_v58 = vpack.c.bf16 %v576_v55, %v575_v54  ;;  %v522_v59 = vpop.xlane.xlu0 %521 }
 0x1a7   : > { %v525_v60 = vpop.xlane.xlu1 %524  ;;  %1520 = vmatprep.subr.bf16.mxu0 %v1519_v58  ;;  %1550 = vmatprep.subr.bf16.mxu1 %v1519_v58 }
 0x1a8   : > { %1522 = vmatpush3.bf16.msra.mxu0 %v1519_v58  ;;  %1554 = vmatpush3.bf16.msra.mxu1 %v1519_v58 }
 0x1a9   : > { %v562_v61 = vpop.xlane.xlu0 %561 }
 0x1aa   : > { %v577_v63 = vsel %vm572_vm4, %v522_v59, %v562_v61 }
 0x1ab   : > { %v565_v62 = vpop.xlane.xlu1 %564 }
 0x1ac   : > { %v578_v0 = vsel %vm572_vm4, %v525_v60, %v565_v62 }
 0x1ad   : > { %v1523_v1 = vpack.c.bf16 %v578_v0, %v577_v63  ;;  %v528_v2 = vpop.xlane.xlu0 %527 }
 0x1af   : > { %v531_v3 = vpop.xlane.xlu1 %530  ;;  %1524 = vmatprep.subr.bf16.mxu0 %v1523_v1  ;;  %1551 = vmatprep.subr.bf16.mxu1 %v1523_v1 }
 0x1b0   : > { %1526 = vmatpush3.bf16.msra.mxu0 %v1523_v1  ;;  %1555 = vmatpush3.bf16.msra.mxu1 %v1523_v1 }
 0x1b1   : > { %v568_v4 = vpop.xlane.xlu0 %567 }
 0x1b2   : > { %v579_v6 = vsel %vm572_vm4, %v528_v2, %v568_v4 }
 0x1b3   : > { %v571_v5 = vpop.xlane.xlu1 %570 }
 0x1b4   : > { %v580_v7 = vsel %vm572_vm4, %v531_v3, %v571_v5 }
 0x1b5   : > { %v1527_v8 = vpack.c.bf16 %v580_v7, %v579_v6 }
 0x1b7   : > { %1528 = vmatprep.subr.bf16.mxu0 %v1527_v8  ;;  %1552 = vmatprep.subr.bf16.mxu1 %v1527_v8 }
 0x1b8   : > { %1530 = vmatpush3.bf16.msra.mxu0 %v1527_v8  ;;  %1556 = vmatpush3.bf16.msra.mxu1 %v1527_v8 }
 0x1bb   : > { %1470 = vmatmul.mubr.msk.f32.vlgmr.msra.gmra.mrb[0].mxu0 %vm589_vm3, %v586_v9  ;;  %1473 = vmatmul.mubr.msk.f32.vlgmr.msra.gmra.mrb[0].mxu1 %vm589_vm3, %v588_v10 }
 0x28e   : > { %v1471_v15 = vpop.f32.mrb[0].mxu0  ;;  %v1474_v16 = vpop.f32.mrb[0].mxu1 }
 0x28f   : > { %v688_v17 = vadd.f32 %v1471_v15, %v582_v11  ;;  %v690_v18 = vadd.f32 %v1474_v16, %v584_v12  ;;  %v668_v19 = vpop.f32.mrb[1].mxu0  ;;  %v678_v20 = vpop.f32.mrb[1].mxu1 }
 0x290   : > { %v687_v21 = vadd.f32 %v668_v19, %v581_v13  ;;  %v689_v22 = vadd.f32 %v678_v20, %v583_v14 }
 0x291   : > { %693 = vst.msk [vmem:[#allocation2 + $0x8] sm:$0xff] %vm691_vm5, %v688_v17  ;;  %695 = vst.msk [vmem:[#allocation2 + $0x18] sm:$0xff] %vm691_vm5, %v690_v18 }
 0x292   : > { %692 = vst.msk [vmem:[#allocation2] sm:$0xff] %vm691_vm5, %v687_v21  ;;  %694 = vst.msk [vmem:[#allocation2 + $0x10] sm:$0xff] %vm691_vm5, %v689_v22 }
 0x293 PF: > { %p696_p1 = scmp.eq.s32.totalorder %s1748_s27, 1 }
 0x294   : > { %s1768_s20 = smov (%p696_p1), 1   ;;  %v738_v63 = vld [vmem:[%s2251_s6] sm:$0xff] (%p696_p1)  ;;  %vm746_vm6 = vcmask (%p696_p1), 261120   ;;  %s1769_s9 = smov (%p696_p1), 127   ;;  %v739_v4 = vld [vmem:[%s2251_s6 + $0x8] sm:$0xff] (%p696_p1)  ;;  %v740_v5 = vld [vmem:[%s2251_s6 + $0x10] sm:$0xff] (%p696_p1) }
 0x295   : > { %700 = sbr.rel (!%p696_p1) target bundleno = 1167 (0x48f), region = 60  ;;  %1503 = vmatprep.mubr.msk.f32.mxu1 (%p696_p1), %vm746_vm6, %v738_v63  ;;  %1483 = vmatprep.mubr.msk.f32.mxu0 (%p696_p1), %vm746_vm6, %v738_v63  ;;  %v741_v6 = vld [vmem:[%s2251_s6 + $0x18] sm:$0xff] (%p696_p1)  ;;  %v742_v7 = vld [vmem:[%s2251_s6 + $0x20] sm:$0xff] (%p696_p1)  ;;  %v743_v8 = vld [vmem:[%s2251_s6 + $0x28] sm:$0xff] (%p696_p1)  ;;  %vm1021_vm7 = vcmask (%p696_p1), 7168  }
 0x296   : > { %v744_v9 = vld [vmem:[%s2251_s6 + $0x30] sm:$0xff] (%p696_p1)  ;;  %v745_v10 = vld [vmem:[%s2251_s6 + $0x38] sm:$0xff] (%p696_p1) }
 0x298   : > { %v704_v25 = vld [vmem:[#allocation2 + $0x18] sm:$0xff] (%p696_p1)  ;;  %v702_v33 = vld [vmem:[#allocation2 + $0x8] sm:$0xff] (%p696_p1) }
 0x299   : > { %v703_v23 = vld [vmem:[#allocation2 + $0x10] sm:$0xff] (%p696_p1)  ;;  %v701_v24 = vld [vmem:[#allocation2] sm:$0xff] (%p696_p1)  ;;  %v709_v32 = vmul.f32 (%p696_p1), 0.001953125, %v704_v25  ;;  %v707_v36 = vmul.f32 (%p696_p1), 0.001953125, %v702_v33 }
 0x29a   : > { %v708_v28 = vmul.f32 (%p696_p1), 0.001953125, %v703_v23  ;;  %v706_v29 = vmul.f32 (%p696_p1), 0.001953125, %v701_v24 }
 0x29b   : > { %v713_v41 = vmul.f32 (%p696_p1), %v709_v32, %v709_v32  ;;  %v711_v42 = vmul.f32 (%p696_p1), %v707_v36, %v707_v36 }
 0x29c   : > { %v712_v37 = vmul.f32 %v708_v28, %v708_v28  ;;  %v710_v40 = vmul.f32 %v706_v29, %v706_v29  ;;  %v1531_v2 = vpack.c.bf16 %v707_v36, %v706_v29  ;;  %v1535_v3 = vpack.c.bf16 %v709_v32, %v708_v28 }
 0x29e   : > { %722 = vrot.lane.b32.xlu1 %v712_v37, %s1768_s20  ;;  %718 = vrot.lane.b32.xlu0 %v710_v40, %s1768_s20 }
 0x29f   : > { %1532 = vmatprep.subr.bf16.mxu0 %v1531_v2 }
 0x2a0   : > { %1534 = vmatpush3.bf16.msra.mxu0 %v1531_v2  ;;  %v1008_v2 = vld [vmem:[%s2248_s3 + $0x18] sm:$0xff] }
 0x2a1   : > { %1536 = vmatprep.subr.bf16.mxu0 %v1535_v3 }
 0x2a2   : > { %724 = vrot.lane.b32.xlu1 %v713_v41, %s1768_s20  ;;  %720 = vrot.lane.b32.xlu0 %v711_v42, %s1768_s20 }
 0x2a4   : > { %1538 = vmatpush3.bf16.msra.mxu0 %v1535_v3 }
 0x2a7   : > { %1484 = vmatmul.mubr.msk.f32.vlgmr.msra.gmra.mrb[0].mxu0 %vm746_vm6, %v739_v4 }
 0x2a8   : > { %1486 = vmatprep.mubr.msk.f32.mxu0 %vm746_vm6, %v740_v5 }
 0x2ab   : > { %1487 = vmatmul.mubr.msk.f32.gmra.mrb[2].mxu0 %vm746_vm6, %v741_v6 }
 0x2ac   : > { %1489 = vmatprep.mubr.msk.f32.mxu0 %vm746_vm6, %v742_v7 }
 0x2af   : > { %1490 = vmatmul.mubr.msk.f32.gmra.mrb[4].mxu0 %vm746_vm6, %v743_v8 }
 0x2b0   : > { %1492 = vmatprep.mubr.msk.f32.mxu0 %vm746_vm6, %v744_v9 }
 0x2b3   : > { %1493 = vmatmul.mubr.msk.f32.gmra.mrb[6].mxu0 %vm746_vm6, %v745_v10 }
 0x310   : > { %v723_v43 = vpop.permute.xlu1 %722  ;;  %v719_v46 = vpop.permute.xlu0 %718 }
 0x311   : > { %v732_v47 = vsub.f32 %v708_v28, %v723_v43  ;;  %v730_v50 = vsub.f32 %v706_v29, %v719_v46 }
 0x313   : > { %v736_v55 = vmax.f32 %v732_v47, 0.0  ;;  %v734_v60 = vmax.f32 %v730_v50, 0.0 }
 0x314   : > { %v725_v51 = vpop.permute.xlu1 %724  ;;  %v721_v54 = vpop.permute.xlu0 %720 }
 0x315   : > { %v733_v58 = vsub.f32 %v709_v32, %v725_v51  ;;  %v731_v59 = vsub.f32 %v707_v36, %v721_v54  ;;  %v1006_v51 = vld [vmem:[%s2248_s3 + $0x8] sm:$0xff] }
 0x317   : > { %v737_v61 = vmax.f32 %v733_v58, 0.0  ;;  %v735_v62 = vmax.f32 %v731_v59, 0.0 }
 0x319   : > { %v1647_v0 = vpack.i.bf16 %v737_v61, %v736_v55  ;;  %v1642_v1 = vpack.i.bf16 %v735_v62, %v734_v60  ;;  %v1005_v55 = vld [vmem:[%s2248_s3] sm:$0xff] }
 0x31b   : > { %1648 = vrot.lane.b32.xlu1 %v1647_v0, %s1769_s9  ;;  %1643 = vrot.lane.b32.xlu0 %v1642_v1, %s1769_s9  ;;  %v1031_v0 = vld [vmem:[%s2249_s4 + $0x8] sm:$0xff] }
 0x37a   : > { %v1485_v19 = vpop.f32.mrb[0].mxu0 }
 0x37b   : > { %v837_v20 = vpop.f32.mrb[1].mxu0 }
 0x37e   : > { %v1488_v21 = vpop.f32.mrb[2].mxu0 }
 0x37f   : > { %v847_v22 = vpop.f32.mrb[3].mxu0 }
 0x382   : > { %v2081_v23 = vpop.f32.mrb[4].mxu0 }
 0x383   : > { %v2083_v24 = vpop.f32.mrb[5].mxu0 }
 0x386   : > { %v2085_v25 = vpop.f32.mrb[6].mxu0 }
 0x387   : > { %v2087_v28 = vpop.f32.mrb[7].mxu0 }
 0x38d   : > { %v1649_v11 = vpop.permute.xlu1 %1648  ;;  %v1644_v12 = vpop.permute.xlu0 %1643 }
 0x38e   : > { %v1651_v13 = vunpack.i.h.bf16 %v1649_v11  ;;  %v1650_v14 = vunpack.i.l.bf16 %v1649_v11  ;;  %v1646_v15 = vunpack.i.h.bf16 %v1644_v12  ;;  %v1645_v16 = vunpack.i.l.bf16 %v1644_v12  ;;  %v1033_v12 = vld [vmem:[%s2249_s4 + $0x18] sm:$0xff] }
 0x390   : > { %v1539_v17 = vpack.c.bf16 %v1646_v15, %v1645_v16  ;;  %v1543_v18 = vpack.c.bf16 %v1651_v13, %v1650_v14  ;;  %v1010_v14 = vld [vmem:[%s2248_s3 + $0x28] sm:$0xff]  ;;  %v1032_v16 = vld [vmem:[%s2249_s4 + $0x10] sm:$0xff] }
 0x392   : > { %1540 = vmatprep.subr.bf16.mxu1 %v1539_v17 }
 0x393   : > { %1542 = vmatpush3.bf16.msra.mxu1 %v1539_v17  ;;  %v1009_v17 = vld [vmem:[%s2248_s3 + $0x20] sm:$0xff] }
 0x394   : > { %1544 = vmatprep.subr.bf16.mxu1 %v1543_v18 }
 0x397   : > { %1546 = vmatpush3.bf16.msra.mxu1 %v1543_v18 }
 0x39a   : > { %1504 = vmatmul.mubr.msk.f32.vlgmr.msra.gmra.mrb[0].mxu1 %vm746_vm6, %v739_v4  ;;  %v1030_v4 = vld [vmem:[%s2249_s4] sm:$0xff] }
 0x39b   : > { %1506 = vmatprep.mubr.msk.f32.mxu1 %vm746_vm6, %v740_v5  ;;  %v1007_v5 = vld [vmem:[%s2248_s3 + $0x10] sm:$0xff] }
 0x39e   : > { %1507 = vmatmul.mubr.msk.f32.gmra.mrb[2].mxu1 %vm746_vm6, %v741_v6 }
 0x39f   : > { %1509 = vmatprep.mubr.msk.f32.mxu1 %vm746_vm6, %v742_v7 }
 0x3a2   : > { %1510 = vmatmul.mubr.msk.f32.gmra.mrb[4].mxu1 %vm746_vm6, %v743_v8 }
 0x3a3   : > { %1512 = vmatprep.mubr.msk.f32.mxu1 %vm746_vm6, %v744_v9 }
 0x3a6   : > { %1513 = vmatmul.mubr.msk.f32.gmra.mrb[6].mxu1 %vm746_vm6, %v745_v10 }
 0x46d   : > { %v1505_v29 = vpop.f32.mrb[0].mxu1 }
 0x46e   : > { %v964_v32 = vadd.f32 1e-05, %v1505_v29  ;;  %v958_v33 = vpop.f32.mrb[1].mxu1 }
 0x46f   : > { %v959_v36 = vadd.f32 1e-05, %v958_v33 }
 0x470   : > { %1652 = vrsqrt.f32 %v964_v32 }
 0x471   : > { %1654 = vrsqrt.f32 %v959_v36  ;;  %v1508_v37 = vpop.f32.mrb[2].mxu1 }
 0x472   : > { %v974_v40 = vadd.f32 1e-05, %v1508_v37  ;;  %v968_v41 = vpop.f32.mrb[3].mxu1  ;;  %v1012_v37 = vld [vmem:[%s2248_s3 + $0x38] sm:$0xff] }
 0x473   : > { %v969_v42 = vadd.f32 1e-05, %v968_v41  ;;  %v1011_v41 = vld [vmem:[%s2248_s3 + $0x30] sm:$0xff] }
 0x474   : > { %1656 = vrsqrt.f32 %v974_v40 }
 0x475   : > { %1658 = vrsqrt.f32 %v969_v42  ;;  %v1511_v43 = vpop.f32.mrb[4].mxu1 }
 0x476   : > { %v984_v46 = vadd.f32 1e-05, %v1511_v43  ;;  %v978_v47 = vpop.f32.mrb[5].mxu1 }
 0x477   : > { %v979_v50 = vadd.f32 1e-05, %v978_v47 }
 0x478   : > { %1660 = vrsqrt.f32 %v984_v46 }
 0x479   : > { %1662 = vrsqrt.f32 %v979_v50  ;;  %v1514_v54 = vpop.f32.mrb[6].mxu1 }
 0x47a   : > { %v1653_v58 = vpop.eup %1652  ;;  %v994_v59 = vadd.f32 1e-05, %v1514_v54  ;;  %v988_v60 = vpop.f32.mrb[7].mxu1 }
 0x47b   : > { %v1655_v61 = vpop.eup %1654  ;;  %v989_v62 = vadd.f32 1e-05, %v988_v60  ;;  %v1014_v63 = vmul.f32 %v1653_v58, %v1006_v51  ;;  %v1036_v58 = vld [vmem:[%s2249_s4 + $0x30] sm:$0xff] }
 0x47c   : > { %1664 = vrsqrt.f32 %v994_v59  ;;  %v1013_v1 = vmul.f32 %v1655_v61, %v1005_v55 }
 0x47d   : > { %1666 = vrsqrt.f32 %v989_v62  ;;  %1023 = vst.msk [vmem:[#allocation3 + $0x8] sm:$0xff] %vm1021_vm7, %v1014_v63  ;;  %v1039_v3 = vmul.f32 %v1485_v19, %v1014_v63 }
 0x47e   : > { %v1657_v6 = vpop.eup %1656  ;;  %1022 = vst.msk [vmem:[#allocation3] sm:$0xff] %vm1021_vm7, %v1013_v1  ;;  %v1038_v7 = vmul.f32 %v1013_v1, %v837_v20 }
 0x47f   : > { %v1659_v8 = vpop.eup %1658  ;;  %v1047_v9 = vsub.f32 %v1031_v0, %v1039_v3  ;;  %v1016_v10 = vmul.f32 %v1657_v6, %v1008_v2 }
 0x480   : > { %v1046_v11 = vsub.f32 %v1030_v4, %v1038_v7  ;;  %v1015_v13 = vmul.f32 %v1659_v8, %v1007_v5 }
 0x481   : > { %1055 = vst.msk [vmem:[#allocation4 + $0x8] sm:$0xff] %vm1021_vm7, %v1047_v9  ;;  %1025 = vst.msk [vmem:[#allocation3 + $0x18] sm:$0xff] %vm1021_vm7, %v1016_v10  ;;  %v1041_v15 = vmul.f32 %v1488_v21, %v1016_v10  ;;  %v1035_v21 = vld [vmem:[%s2249_s4 + $0x28] sm:$0xff] }
 0x482   : > { %v1661_v18 = vpop.eup %1660  ;;  %1054 = vst.msk [vmem:[#allocation4] sm:$0xff] %vm1021_vm7, %v1046_v11  ;;  %1024 = vst.msk [vmem:[#allocation3 + $0x10] sm:$0xff] %vm1021_vm7, %v1015_v13  ;;  %v1040_v19 = vmul.f32 %v1015_v13, %v847_v22  ;;  %v1034_v22 = vld [vmem:[%s2249_s4 + $0x20] sm:$0xff] }
 0x483   : > { %v1663_v20 = vpop.eup %1662  ;;  %v1049_v29 = vsub.f32 %v1033_v12, %v1041_v15  ;;  %v1018_v32 = vmul.f32 %v1661_v18, %v1010_v14 }
 0x484   : > { %v1048_v33 = vsub.f32 %v1032_v16, %v1040_v19  ;;  %v1017_v36 = vmul.f32 %v1663_v20, %v1009_v17 }
 0x485   : > { %1057 = vst.msk [vmem:[#allocation4 + $0x18] sm:$0xff] %vm1021_vm7, %v1049_v29  ;;  %1027 = vst.msk [vmem:[#allocation3 + $0x28] sm:$0xff] %vm1021_vm7, %v1018_v32  ;;  %v1043_v40 = vmul.f32 %v2081_v23, %v1018_v32  ;;  %v1037_v23 = vld [vmem:[%s2249_s4 + $0x38] sm:$0xff] }
 0x486   : > { %v1665_v42 = vpop.eup %1664  ;;  %1056 = vst.msk [vmem:[#allocation4 + $0x10] sm:$0xff] %vm1021_vm7, %v1048_v33  ;;  %1026 = vst.msk [vmem:[#allocation3 + $0x20] sm:$0xff] %vm1021_vm7, %v1017_v36  ;;  %v1042_v43 = vmul.f32 %v1017_v36, %v2083_v24 }
 0x487   : > { %v1667_v46 = vpop.eup %1666  ;;  %v1051_v47 = vsub.f32 %v1035_v21, %v1043_v40  ;;  %v1020_v50 = vmul.f32 %v1665_v42, %v1012_v37 }
 0x488   : > { %v1050_v51 = vsub.f32 %v1034_v22, %v1042_v43  ;;  %v1019_v54 = vmul.f32 %v1667_v46, %v1011_v41 }
 0x489   : > { %1059 = vst.msk [vmem:[#allocation4 + $0x28] sm:$0xff] %vm1021_vm7, %v1051_v47  ;;  %1029 = vst.msk [vmem:[#allocation3 + $0x38] sm:$0xff] %vm1021_vm7, %v1020_v50  ;;  %v1045_v55 = vmul.f32 %v2085_v25, %v1020_v50 }
 0x48a   : > { %1058 = vst.msk [vmem:[#allocation4 + $0x20] sm:$0xff] %vm1021_vm7, %v1050_v51  ;;  %1028 = vst.msk [vmem:[#allocation3 + $0x30] sm:$0xff] %vm1021_vm7, %v1019_v54  ;;  %v1044_v24 = vmul.f32 %v1019_v54, %v2087_v28 }
 0x48b   : > { %v1053_v59 = vsub.f32 %v1037_v23, %v1045_v55 }
 0x48c   : > { %v1052_v60 = vsub.f32 %v1036_v58, %v1044_v24 }
 0x48d   : > { %1061 = vst.msk [vmem:[#allocation4 + $0x38] sm:$0xff] %vm1021_vm7, %v1053_v59 }
 0x48e   : > { %1060 = vst.msk [vmem:[#allocation4 + $0x30] sm:$0xff] %vm1021_vm7, %v1052_v60 }
 0x48f PF: > { %p1391_p2 = scmp.ne.s32.totalorder %s1748_s27, 1 }
 0x490   : > { %v1067_v25 = vld [vmem:[#allocation3 + $0x10] sm:$0xff] (!%p1391_p2)  ;;  %v1065_v61 = vld [vmem:[#allocation3] sm:$0xff] (!%p1391_p2)  ;;  %v1770_v62 = vmov (!%p1391_p2), 0   ;;  %v1068_v63 = vld [vmem:[#allocation3 + $0x18] sm:$0xff] (!%p1391_p2) }
 0x491   : > { %1064 = sbr.rel (%p1391_p2) target bundleno = 1332 (0x534), region = 64  ;;  %1669 = vset.pattern.permute.xlu1 (!%p1391_p2), %v1770_v62  ;;  %1668 = vset.pattern.permute.xlu0 (!%p1391_p2), %v1770_v62  ;;  %v1066_v0 = vld [vmem:[#allocation3 + $0x8] sm:$0xff] (!%p1391_p2)  ;;  %v1069_v1 = vld [vmem:[#allocation3 + $0x20] sm:$0xff] (!%p1391_p2)  ;;  %v1072_v2 = vld [vmem:[#allocation3 + $0x38] sm:$0xff] (!%p1391_p2) }
 0x492   : > { %1085 = vperm.xlu1 (!%p1391_p2), %1669, %v1067_v25   ;;  %1075 = vperm.xlu0 (!%p1391_p2), %1668, %v1065_v61   ;;  %v1070_v28 = vld [vmem:[#allocation3 + $0x28] sm:$0xff] (!%p1391_p2)  ;;  %v1071_v3 = vld [vmem:[#allocation3 + $0x30] sm:$0xff] (!%p1391_p2)  ;;  %v1129_v5 = vld [vmem:[#allocation4] sm:$0xff] (!%p1391_p2) }
 0x493   : > { %v1130_v4 = vld [vmem:[#allocation4 + $0x8] sm:$0xff] (!%p1391_p2)  ;;  %v1132_v6 = vld [vmem:[#allocation4 + $0x18] sm:$0xff] (!%p1391_p2)  ;;  %v1131_v7 = vld [vmem:[#allocation4 + $0x10] sm:$0xff] (!%p1391_p2) }
 0x494   : > { %v1134_v8 = vld [vmem:[#allocation4 + $0x28] sm:$0xff] (!%p1391_p2)  ;;  %v1133_v9 = vld [vmem:[#allocation4 + $0x20] sm:$0xff] (!%p1391_p2)  ;;  %v1136_v10 = vld [vmem:[#allocation4 + $0x38] sm:$0xff] (!%p1391_p2) }
 0x495   : > { %v1135_v11 = vld [vmem:[#allocation4 + $0x30] sm:$0xff] (!%p1391_p2) }
 0x496   : > { %1090 = vperm.xlu1 (!%p1391_p2), %1669, %v1068_v63   ;;  %1080 = vperm.xlu0 (!%p1391_p2), %1668, %v1066_v0  }
 0x49a   : > { %1100 = vperm.xlu1 %1669, %v1070_v28   ;;  %1095 = vperm.xlu0 %1668, %v1069_v1  }
 0x49e   : > { %1110 = vperm.xlu1 %1669, %v1072_v2   ;;  %1105 = vperm.xlu0 %1668, %v1071_v3  }
 0x4a2   : > { %1144 = vperm.xlu1 %1669, %v1130_v4   ;;  %1139 = vperm.xlu0 %1668, %v1129_v5  }
 0x4a6   : > { %1154 = vperm.xlu1 %1669, %v1132_v6   ;;  %1149 = vperm.xlu0 %1668, %v1131_v7  }
 0x4aa   : > { %1164 = vperm.xlu1 %1669, %v1134_v8   ;;  %1159 = vperm.xlu0 %1668, %v1133_v9  }
 0x4ae   : > { %1174 = vperm.xlu1 %1669, %v1136_v10   ;;  %1169 = vperm.xlu0 %1668, %v1135_v11  }
 0x511   : > { %v1086_v12 = vpop.permute.xlu1 %1085  ;;  %v1076_v13 = vpop.permute.xlu0 %1075 }
 0x512   : > { %v1113_v20 = vmul.f32 %v1076_v13, %v1930_v26  ;;  %v1114_v29 = vmul.f32 %v1076_v13, %v1934_v30  ;;  %v1117_v42 = vmul.f32 %v1086_v12, %v1946_v44  ;;  %v1118_v43 = vmul.f32 %v1086_v12, %v1950_v48 }
 0x515   : > { %v1091_v14 = vpop.permute.xlu1 %1090  ;;  %v1081_v15 = vpop.permute.xlu0 %1080 }
 0x516   : > { %v1115_v32 = vmul.f32 %v1081_v15, %v1938_v34  ;;  %v1116_v33 = vmul.f32 %v1081_v15, %v1942_v38  ;;  %v1119_v26 = vmul.f32 %v1091_v14, %v1954_v52  ;;  %v1120_v30 = vmul.f32 %v1091_v14, %v1958_v56 }
 0x519   : > { %v1101_v16 = vpop.permute.xlu1 %1100  ;;  %v1096_v17 = vpop.permute.xlu0 %1095 }
 0x51a   : > { %v1123_v44 = vmul.f32 %v1101_v16, %v1940_v35  ;;  %v1124_v48 = vmul.f32 %v1101_v16, %v1944_v39  ;;  %v1121_v52 = vmul.f32 %v1096_v17, %v1932_v27  ;;  %v1122_v56 = vmul.f32 %v1096_v17, %v1936_v31 }
 0x51d   : > { %v1111_v18 = vpop.permute.xlu1 %1110  ;;  %v1106_v19 = vpop.permute.xlu0 %1105 }
 0x51e   : > { %v1127_v35 = vmul.f32 %v1111_v18, %v1956_v53  ;;  %v1128_v39 = vmul.f32 %v1111_v18, %v1960_v57  ;;  %v1125_v27 = vmul.f32 %v1106_v19, %v1948_v45  ;;  %v1126_v31 = vmul.f32 %v1106_v19, %v1952_v49 }
 0x521   : > { %v1145_v21 = vpop.permute.xlu1 %1144  ;;  %v1140_v36 = vpop.permute.xlu0 %1139 }
 0x522   : > { %v1179_v37 = vadd.f32 %v1145_v21, %v1115_v32  ;;  %v1180_v40 = vadd.f32 %v1145_v21, %v1116_v33  ;;  %v1177_v22 = vadd.f32 %v1140_v36, %v1113_v20  ;;  %v1178_v41 = vadd.f32 %v1140_v36, %v1114_v29 }
 0x524   : > { %v1409_v46 = vpack.c.bf16 %v1180_v40, %v1179_v37  ;;  %v1408_v34 = vpack.c.bf16 %v1178_v41, %v1177_v22 }
 0x525   : > { %v1155_v47 = vpop.permute.xlu1 %1154  ;;  %v1150_v38 = vpop.permute.xlu0 %1149 }
 0x526   : > { %1242 = vst [vmem:[%s1963_s11 + $0x8] sm:$0xff] %v1409_v46  ;;  %1241 = vst [vmem:[%s1963_s11] sm:$0xff] %v1408_v34  ;;  %v1183_v50 = vadd.f32 %v1155_v47, %v1119_v26  ;;  %v1184_v51 = vadd.f32 %v1155_v47, %v1120_v30  ;;  %v1181_v23 = vadd.f32 %v1150_v38, %v1117_v42 }
 0x527   : > { %v1182_v54 = vadd.f32 %v1150_v38, %v1118_v43 }
 0x528   : > { %v1411_v55 = vpack.c.bf16 %v1184_v51, %v1183_v50 }
 0x529   : > { %v1410_v58 = vpack.c.bf16 %v1182_v54, %v1181_v23  ;;  %v1165_v24 = vpop.permute.xlu1 %1164  ;;  %v1160_v59 = vpop.permute.xlu0 %1159 }
 0x52a   : > { %1244 = vst [vmem:[%s1963_s11 + $0x18] sm:$0xff] %v1411_v55  ;;  %v1187_v60 = vadd.f32 %v1165_v24, %v1123_v44  ;;  %v1188_v25 = vadd.f32 %v1165_v24, %v1124_v48  ;;  %v1185_v61 = vadd.f32 %v1160_v59, %v1121_v52  ;;  %v1186_v62 = vadd.f32 %v1160_v59, %v1122_v56 }
 0x52b   : > { %1243 = vst [vmem:[%s1963_s11 + $0x10] sm:$0xff] %v1410_v58 }
 0x52c   : > { %v1413_v63 = vpack.c.bf16 %v1188_v25, %v1187_v60  ;;  %v1412_v0 = vpack.c.bf16 %v1186_v62, %v1185_v61 }
 0x52d   : > { %v1175_v28 = vpop.permute.xlu1 %1174  ;;  %v1170_v1 = vpop.permute.xlu0 %1169 }
 0x52e   : > { %1246 = vst [vmem:[%s1963_s11 + $0x28] sm:$0xff] %v1413_v63  ;;  %1245 = vst [vmem:[%s1963_s11 + $0x20] sm:$0xff] %v1412_v0  ;;  %v1191_v2 = vadd.f32 %v1175_v28, %v1127_v35  ;;  %v1192_v3 = vadd.f32 %v1175_v28, %v1128_v39  ;;  %v1189_v4 = vadd.f32 %v1170_v1, %v1125_v27 }
 0x52f   : > { %v1190_v5 = vadd.f32 %v1170_v1, %v1126_v31 }
 0x530   : > { %v1415_v6 = vpack.c.bf16 %v1192_v3, %v1191_v2 }
 0x531   : > { %v1414_v53 = vpack.c.bf16 %v1190_v5, %v1189_v4 }
 0x532   : > { %1248 = vst [vmem:[%s1963_s11 + $0x38] sm:$0xff] %v1415_v6 }
 0x533   : > { %1247 = vst [vmem:[%s1963_s11 + $0x30] sm:$0xff] %v1414_v53 }
 0x534 PF: > { %s1416_s27 = sshll.u32 %s1752_s28, 10  ;;  %s1266_s12 = sshll.u32 %s1963_s11, 4  ;;  %s2189_s12 = int_to_ptr.vmem [resolvable:$true] %s1266_s12 }
 0x535   : > { %s2186_s19 = scalar_lea.hbm %s2252_s7, %s1416_s27  ;;  %s2261_s30 = sand.u32 1, %s1740_s25  }
 0x536   : > { %s2193_s18 = scalar_lea.sflag [#allocation6], %s2261_s30  ;;  %s1670_s10 = scalar_lea.vmem %s2189_s12, 1024 }
 0x537   : > { %p1671_p4 = scmp.ne.s32.totalorder %s2189_s12, %s1670_s10  ;;  %s1771_s28 = smov [#allocation5]  }
 0x538   : > { %s1674_s15 = sshll.u32 %s1771_s28, 4  ;;  %s1675_s15 = int_to_ptr.vmem [resolvable:$false] %s1674_s15 }
 0x539   : > { %p1672_p5 = pnand %p1671_p4, %p1863_p3  ;;  %s1676_s16 = scalar_lea.vmem %s1675_s15, 2048 }
 0x53a   : > { %p1677_p7 = scmp.lt.s32.totalorder %s2189_s12, %s1675_s15  ;;  %p1678_p8 = scmp.lt.s32.totalorder %s1676_s16, %s1670_s10 }
 0x53b   : > { %p1673_p6 = pneg %p1672_p5 }
 0x53c   : > { %p1679_p10 = por %p1678_p8, %p1677_p7 }
 0x53e   : > { %p1680_p11 = pnand %p1679_p10, %p1673_p6 }
 0x540   : > { %1683 = shalt.err (!%p1680_p11)
}
 0x541   : > { %s1684_s11 = scalar_lea.hbm %s2186_s19, 1024  ;;  %s1688_s22 = scalar_lea.hbm %s2252_s7, 2048 }
 0x542   : > { %p1685_p12 = scmp.ne.s32.totalorder %s2186_s19, %s1684_s11  ;;  %p1689_p1 = scmp.lt.u32.totalorder %s2186_s19, %s2252_s7 }
 0x543   : > { %p1690_p2 = scmp.lt.u32.totalorder %s1688_s22, %s1684_s11  ;;  %p1692_p5 = scmp.lt.u32.totalorder %s1684_s11, %s2186_s19 }
 0x544   : > { %p1686_p13 = pnand %p1685_p12, %p1863_p3 }
 0x545   : > { %p1691_p4 = por %p1690_p2, %p1689_p1 }
 0x546   : > { %p1687_p0 = pneg %p1686_p13 }
 0x547   : > { %p1693_p6 = por %p1692_p5, %p1691_p4 }
 0x549   : > { %p1694_p7 = pnand %p1693_p6, %p1687_p0 }
 0x54b   : > { %1697 = shalt.err (!%p1694_p7)
}
 0x54c   : > { %s1772_s9 = smov 128   ;;  %s1773_s30 = smov 8  }
 0x54d   : > { %1557 = dma.vmem_to_hbm [thread:$0]  (%p1863_p3), %s2189_s12, 1024, %s2186_s19, %s2193_s18, %s1772_s9, %s1772_s9, %s1773_s30  }
 0x54e PF: > { %p1563_p8 = scmp.ge.s32.totalorder %s1764_s8, 2  ;;  %s1281_s10 = sand.u32 1, %s1736_s24  }
 0x54f   : > { %s1282_s28 = scalar_lea.sflag [#allocation6], %s1281_s10 }
 0x550   : > { %p1560_p10 = pnand %p1563_p8, %p1873_p9 }
 0x552   : > { %1731 = dma.done.wait (!%p1560_p10), %s1282_s28, 1024  }
 0x553   : > { %1733 = vsyncadd (!%p1560_p10), %s1282_s28, 4294966272  ;;  %s20_s8 = sadd.s32 1, %s1764_s8   ;;  %s2262_s28 = sld [smem:[#allocation8_spill]] }
 0x554   : > { %p17_p11 = scmp.ge.s32.totalorder %s20_s8, 6   ;;  %s2263_s13 = sld [smem:[#allocation9_spill]] }
 0x555   : > { %s2264_s30 = sld [smem:[#allocation10_spill]]  ;;  %s2265_s24 = smov %s1740_s25 }
 0x556   : > { %s2266_s25 = smov %s1744_s26  ;;  %s2267_s26 = smov %s1881_s17 }
 0x557   : > { %s2268_s27 = smov %s1756_s29  ;;  %19 = sbr.rel (!%p17_p11) target bundleno = 5 (0x5), region = 99 }
 0x55a   : > { %s2269_s29 = smov %s2263_s13 }
 0x55e   :  { %1287 = vsyncpa [#allocation6], 1 }
 0x55f   :  { %1289 = vsyncpa [#allocation6 + $0x1], 1 }

</bundles_post_ra>
